<compile_context>
chip_gen: v5e
topology: v5e:2x2
jax: 0.10.0
libtpu: 0.0.40
codegen_flags: <defaults>
</compile_context>

<pallas_src>
import functools

import jax
import jax.numpy as jnp
from jax import lax
from jax.experimental import pallas as pl
from jax.experimental.pallas import tpu as pltpu


def _round_up(x, m):
    return ((x + m - 1) // m) * m


def _linear_wn_kernel(x_ref, v_ref, s_ref, b_ref, o_ref, acc_ref):
    # Zero the accumulator at the first K step.
    @pl.when(pl.program_id(2) == 0)
    def _():
        acc_ref[...] = jnp.zeros_like(acc_ref)

    # (tm, tk) x (tn, tk) -> (tm, tn), contracting the K dims of both operands
    # (trans_b matmul: no explicit w.T / XLU transpose in the hot loop).
    acc_ref[...] += lax.dot_general(
        x_ref[...], v_ref[...],
        dimension_numbers=(((1,), (1,)), ((), ())),
        preferred_element_type=jnp.float32,
    )

    # Finalize once at the last K step: weight-norm scale + bias epilogue.
    @pl.when(pl.program_id(2) == pl.num_programs(2) - 1)
    def _():
        o_ref[...] = (acc_ref[...] * s_ref[...] + b_ref[...]).astype(o_ref.dtype)


@functools.partial(jax.jit, static_argnames=("tm", "tn", "tk"))
def linear_weight_norm(x, v, g, b, *, tm=256, tn=256, tk=512):
    """x: (B, In), v: (Out, In), g: (Out, 1), b: (1, Out) -> (B, Out)."""
    B, In = x.shape
    Out = v.shape[0]

    # Per-output-row weight-norm scale, computed once on the real (unpadded)
    # weights as a tiny XLA op; kept lane-dense as a (1, Out) row vector.
    v32 = v.astype(jnp.float32)
    scale = (g.astype(jnp.float32).reshape(1, Out)
             * lax.rsqrt(jnp.sum(v32 * v32, axis=-1)).reshape(1, Out))
    bias = b.astype(jnp.float32).reshape(1, Out)

    # Clamp tile sizes to the (8, 128)-aligned padded problem dims.
    tm = min(tm, _round_up(B, 8))
    tn = min(tn, _round_up(Out, 128))
    tk = min(tk, _round_up(In, 128))

    Mp, Np, Kp = _round_up(B, tm), _round_up(Out, tn), _round_up(In, tk)

    x_p = jnp.pad(x, ((0, Mp - B), (0, Kp - In)))
    v_p = jnp.pad(v, ((0, Np - Out), (0, Kp - In)))
    s_p = jnp.pad(scale, ((0, 0), (0, Np - Out)))
    b_p = jnp.pad(bias, ((0, 0), (0, Np - Out)))

    grid = (Mp // tm, Np // tn, Kp // tk)

    itemsize = jnp.dtype(x.dtype).itemsize
    cost = pl.CostEstimate(
        flops=2 * Mp * Np * Kp,
        transcendentals=0,
        bytes_accessed=(Mp * Kp + Np * Kp + Mp * Np) * itemsize,
    )

    y_p = pl.pallas_call(
        _linear_wn_kernel,
        out_shape=jax.ShapeDtypeStruct((Mp, Np), x.dtype),
        grid_spec=pltpu.PrefetchScalarGridSpec(
            num_scalar_prefetch=0,
            grid=grid,
            in_specs=[
                pl.BlockSpec((tm, tk), lambda i, j, k: (i, k)),   # x      (M, K)
                pl.BlockSpec((tn, tk), lambda i, j, k: (j, k)),   # v      (N, K)
                pl.BlockSpec((1, tn), lambda i, j, k: (0, j)),    # scale  (1, N)
                pl.BlockSpec((1, tn), lambda i, j, k: (0, j)),    # bias   (1, N)
            ],
            out_specs=pl.BlockSpec((tm, tn), lambda i, j, k: (i, j)),
            scratch_shapes=[pltpu.VMEM((tm, tn), jnp.float32)],
        ),
        compiler_params=pltpu.CompilerParams(
            dimension_semantics=("parallel", "parallel", "arbitrary"),
            vmem_limit_bytes=32 * 1024 * 1024,
        ),
        cost_estimate=cost,
    )(x_p, v_p, s_p, b_p)

    return y_p[:B, :Out]


if __name__ == "__main__":
    key = jax.random.PRNGKey(0)
    k_x, k_w = jax.random.split(key)

    batch, in_features, out_features = 8, 32, 64

    # Mirror the module's reset_parameters():
    #   weight ~ N(0, 0.05), bias = 0, then weight_norm: v = weight, g = ||v||_row
    v = (0.05 * jax.random.normal(k_w, (out_features, in_features))).astype(jnp.float32)
    g = jnp.sqrt(jnp.sum(v * v, axis=-1, keepdims=True)).astype(jnp.float32)  # (Out, 1)
    b = jnp.zeros((1, out_features), dtype=jnp.float32)
    x = jax.random.normal(k_x, (batch, in_features), dtype=jnp.float32)

    y = linear_weight_norm(x, v, g, b)
    jax.block_until_ready(y)

    # Pure-JAX reference check
    w_eff = v * (g / jnp.sqrt(jnp.sum(v * v, axis=-1, keepdims=True)))
    y_ref = x @ w_eff.T + b
    assert jnp.allclose(y, y_ref, atol=1e-5, rtol=1e-5), float(jnp.max(jnp.abs(y - y_ref)))

    print("KERNEL_OK")
</pallas_src>

<mosaic_0001>
module attributes {stable_mosaic.version = 11 : i64} {
  func.func @_linear_wn_kernel(%arg0: i32, %arg1: i32, %arg2: i32, %arg3: memref<8x128xf32, #tpu.memory_space<vmem>>, %arg4: memref<128x128xf32, #tpu.memory_space<vmem>>, %arg5: memref<1x128xf32, #tpu.memory_space<vmem>>, %arg6: memref<1x128xf32, #tpu.memory_space<vmem>>, %arg7: memref<8x128xf32, #tpu.memory_space<vmem>>, %arg8: memref<8x128xf32, #tpu.memory_space<vmem>>) attributes {dimension_semantics = [#tpu.dimension_semantics<parallel>, #tpu.dimension_semantics<parallel>, #tpu.dimension_semantics<arbitrary>], iteration_bounds = array<i64: 1, 1, 1>, scalar_prefetch = 0 : i64, scratch_operands = 1 : i64, tpu.core_type = #tpu.core_type<tc>, window_params = [{transform_indices = @transform_0, window_bounds = array<i64: 8, 128>}, {transform_indices = @transform_1, window_bounds = array<i64: 128, 128>}, {transform_indices = @transform_2, window_bounds = array<i64: 1, 128>}, {transform_indices = @transform_3, window_bounds = array<i64: 1, 128>}, {transform_indices = @transform_4, window_bounds = array<i64: 8, 128>}]} {
    %c0_i32 = arith.constant 0 : i32
    %0 = arith.cmpi eq, %arg2, %c0_i32 : i32
    %1 = arith.extui %0 : i1 to i32
    %c0_i32_0 = arith.constant 0 : i32
    %2 = arith.cmpi ne, %1, %c0_i32_0 : i32
    scf.if %2 {
      %cst_10 = arith.constant 0.000000e+00 : f32
      %12 = vector.broadcast %cst_10 : f32 to vector<8x128xf32>
      %c0_11 = arith.constant 0 : index
      %c0_12 = arith.constant 0 : index
      %13 = vector.load %arg8[%c0_11, %c0_12] : memref<8x128xf32, #tpu.memory_space<vmem>>, vector<8x128xf32>
      tpu.vector_store %arg8[%c0_11, %c0_12], %12 {strides = array<i32>} : memref<8x128xf32, #tpu.memory_space<vmem>>, vector<8x128xf32>,
    } else {
    }
    %c0 = arith.constant 0 : index
    %c0_1 = arith.constant 0 : index
    %3 = vector.load %arg8[%c0, %c0_1] : memref<8x128xf32, #tpu.memory_space<vmem>>, vector<8x128xf32>
    %c0_2 = arith.constant 0 : index
    %c0_3 = arith.constant 0 : index
    %4 = vector.load %arg3[%c0_2, %c0_3] : memref<8x128xf32, #tpu.memory_space<vmem>>, vector<8x128xf32>
    %c0_4 = arith.constant 0 : index
    %c0_5 = arith.constant 0 : index
    %5 = vector.load %arg4[%c0_4, %c0_5] : memref<128x128xf32, #tpu.memory_space<vmem>>, vector<128x128xf32>
    %cst = arith.constant dense<0.000000e+00> : vector<8x128xf32>
    %6 = tpu.matmul %4, %5, %cst {dimension_numbers = #tpu.dot_dimension_numbers<[1], [1], [0], [0], [0, 0, 1, 0], [], []>} : vector<8x128xf32>, vector<128x128xf32>, vector<8x128xf32> -> vector<8x128xf32>
    %7 = arith.addf %3, %6 : vector<8x128xf32>
    %c0_6 = arith.constant 0 : index
    %c0_7 = arith.constant 0 : index
    %8 = vector.load %arg8[%c0_6, %c0_7] : memref<8x128xf32, #tpu.memory_space<vmem>>, vector<8x128xf32>
    tpu.vector_store %arg8[%c0_6, %c0_7], %7 {strides = array<i32>} : memref<8x128xf32, #tpu.memory_space<vmem>>, vector<8x128xf32>,
    %c0_i32_8 = arith.constant 0 : i32
    %9 = arith.cmpi eq, %arg2, %c0_i32_8 : i32
    %10 = arith.extui %9 : i1 to i32
    %c0_i32_9 = arith.constant 0 : i32
    %11 = arith.cmpi ne, %10, %c0_i32_9 : i32
    scf.if %11 {
      %c0_10 = arith.constant 0 : index
      %c0_11 = arith.constant 0 : index
      %12 = vector.load %arg8[%c0_10, %c0_11] : memref<8x128xf32, #tpu.memory_space<vmem>>, vector<8x128xf32>
      %c0_12 = arith.constant 0 : index
      %c0_13 = arith.constant 0 : index
      %13 = vector.load %arg5[%c0_12, %c0_13] : memref<1x128xf32, #tpu.memory_space<vmem>>, vector<1x128xf32>
      %14 = vector.broadcast %13 : vector<1x128xf32> to vector<8x128xf32>
      %15 = arith.mulf %12, %14 : vector<8x128xf32>
      %c0_14 = arith.constant 0 : index
      %c0_15 = arith.constant 0 : index
      %16 = vector.load %arg6[%c0_14, %c0_15] : memref<1x128xf32, #tpu.memory_space<vmem>>, vector<1x128xf32>
      %17 = vector.broadcast %16 : vector<1x128xf32> to vector<8x128xf32>
      %18 = arith.addf %15, %17 : vector<8x128xf32>
      %c0_16 = arith.constant 0 : index
      %c0_17 = arith.constant 0 : index
      %19 = vector.load %arg7[%c0_16, %c0_17] : memref<8x128xf32, #tpu.memory_space<vmem>>, vector<8x128xf32>
      tpu.vector_store %arg7[%c0_16, %c0_17], %18 {strides = array<i32>} : memref<8x128xf32, #tpu.memory_space<vmem>>, vector<8x128xf32>,
    } else {
    }
    return
  }
  func.func @transform_0(%arg0: i32, %arg1: i32, %arg2: i32) -> (i32, i32) {
    %c0_i32 = arith.constant 0 : i32
    return %arg0, %arg2 : i32, i32
  }
  func.func @transform_1(%arg0: i32, %arg1: i32, %arg2: i32) -> (i32, i32) {
    %c0_i32 = arith.constant 0 : i32
    return %arg1, %arg2 : i32, i32
  }
  func.func @transform_2(%arg0: i32, %arg1: i32, %arg2: i32) -> (i32, i32) {
    %c0_i32 = arith.constant 0 : i32
    %c0_i32_0 = arith.constant 0 : i32
    return %c0_i32, %arg1 : i32, i32
  }
  func.func @transform_3(%arg0: i32, %arg1: i32, %arg2: i32) -> (i32, i32) {
    %c0_i32 = arith.constant 0 : i32
    %c0_i32_0 = arith.constant 0 : i32
    return %c0_i32, %arg1 : i32, i32
  }
  func.func @transform_4(%arg0: i32, %arg1: i32, %arg2: i32) -> (i32, i32) {
    %c0_i32 = arith.constant 0 : i32
    return %arg0, %arg1 : i32, i32
  }
}

</mosaic_0001>

<bundles_post_ra>
// kernel: linear_weight_norm.1
= control target key start
LH: loop header
LB: loop body
LE: loop exit
PB: predicated region body
PF: predicated region fallthrough
CT: control target
= control target key end

     0   :  { %s209_s0 = inlined_call_operand.vmem [shape: f32[8,128], index: 0, kind: input, shape index: {}]   ;;  %s210_s1 = inlined_call_operand.vmem [shape: f32[128,128], index: 1, kind: input, shape index: {}]   ;;  %s211_s2 = inlined_call_operand.vmem [shape: f32[1,128], index: 2, kind: input, shape index: {}]   ;;  %s212_s3 = inlined_call_operand.vmem [shape: f32[1,128], index: 3, kind: input, shape index: {}]   ;;  %s213_s4 = inlined_call_operand.hbm [shape: f32[8,128], index: 4, kind: output, shape index: {}]  }
   0x1   :  { %v40_v0 = vld [vmem:[%s210_s1 + $0x78] sm:$0xff]  ;;  %v39_v1 = vld [vmem:[%s210_s1 + $0x70] sm:$0xff] }
   0x2   :  { %41 = vmatpush.xpose.msra.mxu0 %v40_v0 }
   0x3   :  { %9 = vsyncpa [#allocation4], 0  ;;  %v38_v2 = vld [vmem:[%s210_s1 + $0x68] sm:$0xff]  ;;  %v37_v3 = vld [vmem:[%s210_s1 + $0x60] sm:$0xff]  ;;  %s123_s27 = smov [#allocation3]  }
   0x4   :  { %v36_v4 = vld [vmem:[%s210_s1 + $0x58] sm:$0xff]  ;;  %v35_v5 = vld [vmem:[%s210_s1 + $0x50] sm:$0xff]  ;;  %v34_v6 = vld [vmem:[%s210_s1 + $0x48] sm:$0xff]  ;;  %s83_s28 = sshll.u32 %s123_s27, 4  ;;  %s84_s28 = int_to_ptr.vmem [resolvable:$true] %s83_s28 }
   0x5   :  { %v33_v7 = vld [vmem:[%s210_s1 + $0x40] sm:$0xff]  ;;  %v32_v8 = vld [vmem:[%s210_s1 + $0x38] sm:$0xff]  ;;  %v31_v9 = vld [vmem:[%s210_s1 + $0x30] sm:$0xff] }
   0x6   :  { %42 = vmatpush.xpose.msra.mxu0 %v39_v1  ;;  %v30_v10 = vld [vmem:[%s210_s1 + $0x28] sm:$0xff]  ;;  %v29_v11 = vld [vmem:[%s210_s1 + $0x20] sm:$0xff]  ;;  %v28_v12 = vld [vmem:[%s210_s1 + $0x18] sm:$0xff] }
   0x7   :  { %v27_v13 = vld [vmem:[%s210_s1 + $0x10] sm:$0xff]  ;;  %v26_v14 = vld [vmem:[%s210_s1 + $0x8] sm:$0xff]  ;;  %v25_v15 = vld [vmem:[%s210_s1] sm:$0xff]  ;;  %s85_s1 = sshll.u32 %s213_s4, 4  ;;  %s86_s1 = int_to_ptr.hbm [resolvable:$true] %s85_s1 }
   0x8   :  { %v24_v16 = vld [vmem:[%s209_s0] sm:$0xff] }
   0x9   :  { %v95_v17 = vld [vmem:[%s211_s2] ss:$0 sm:$0xff] }
   0xa   :  { %43 = vmatpush.xpose.msra.mxu0 %v38_v2  ;;  %v96_v18 = vld [vmem:[%s212_s3] ss:$0 sm:$0xff] }
   0xe   :  { %44 = vmatpush.xpose.msra.mxu0 %v37_v3 }
  0x12   :  { %45 = vmatpush.xpose.msra.mxu0 %v36_v4 }
  0x16   :  { %46 = vmatpush.xpose.msra.mxu0 %v35_v5 }
  0x1a   :  { %47 = vmatpush.xpose.msra.mxu0 %v34_v6 }
  0x1e   :  { %48 = vmatpush.xpose.msra.mxu0 %v33_v7 }
  0x22   :  { %49 = vmatpush.xpose.msra.mxu0 %v32_v8 }
  0x26   :  { %50 = vmatpush.xpose.msra.mxu0 %v31_v9 }
  0x2a   :  { %51 = vmatpush.xpose.msra.mxu0 %v30_v10 }
  0x2e   :  { %52 = vmatpush.xpose.msra.mxu0 %v29_v11 }
  0x32   :  { %53 = vmatpush.xpose.msra.mxu0 %v28_v12 }
  0x36   :  { %54 = vmatpush.xpose.msra.mxu0 %v27_v13 }
  0x3a   :  { %55 = vmatpush.xpose.msra.mxu0 %v26_v14 }
  0x3e   :  { %56 = vmatpush.xpose.msra.mxu0 %v25_v15 }
  0x41   :  { %57 = vmatmul.f32.vlgmr.msra.gmra.mxu0 %v24_v16 }
  0xbe   :  { %v58_v19 = vpop.f32.mrf.mxu0 }
  0xbf   :  { %v71_v20 = vmul.f32 %v95_v17, %v58_v19 }
  0xc1   :  { %v76_v21 = vadd.f32 %v96_v18, %v71_v20 }
  0xc3   :  { %77 = vst [vmem:[#allocation3] sm:$0xff] %v76_v21 }
  0xc4   :  { %88 = dma.vmem_to_hbm [thread:$0]  %s84_s28, 128, %s86_s1, [#allocation4]  }
  0xc5   :  { %121 = dma.done.wait [#allocation4], 128  }
  0xc6   :  { %122 = vsyncadd [#allocation4], 4294967168 }
  0xc7   :  { %93 = vsyncpa [#allocation4], 1 }

</bundles_post_ra>
